<compile_context>
chip_gen: v5e
topology: v5e:2x2
jax: 0.10.0
libtpu: 0.0.40
codegen_flags: <defaults>
</compile_context>

<pallas_src>
import functools

import jax
import jax.numpy as jnp
from jax.experimental import pallas as pl
from jax.experimental.pallas import tpu as pltpu


def _round_up(x, m):
    return ((x + m - 1) // m) * m


def _sublane_multiple(dtype):
    # bf16 packs 2 rows per vreg sublane, int8/fp8 pack 4 -> round the
    # second-minor MXU-operand block dim accordingly for clean vreg packing.
    return max(8, 32 // jnp.dtype(dtype).itemsize)


def _mlloss_kernel(emb_ref, ker_ref, out_ref, acc_ref, kn_ref, *,
                   s, eps, tm, tk, emb_resident):
    i = pl.program_id(1)           # batch tile   (arbitrary)
    k = pl.program_id(2)           # feature tile (arbitrary, innermost)
    nk = pl.num_programs(2)

    ker = ker_ref[...]             # (tk, tn) weight slice (resident this step)

    # ---- fused column norms: computed once per class tile (first batch step),
    #      accumulated over the K axis, reused for every later batch step. ----
    @pl.when(i == 0)
    def _():
        k32 = ker.astype(jnp.float32)
        ssq = jnp.sum(k32 * k32, axis=0, keepdims=True)        # (1, tn)

        @pl.when(k == 0)
        def _():
            kn_ref[...] = ssq

        @pl.when(k != 0)
        def _():
            kn_ref[...] = kn_ref[...] + ssq

    # ---- matmul accumulate (f32 accumulator across the K axis) -------------
    @pl.when(k == 0)
    def _():
        acc_ref[...] = jnp.zeros_like(acc_ref)

    if emb_resident:
        # Embeddings are a single resident VMEM block (fetched from HBM once);
        # slice the (tm, tk) operand out of it with aligned dynamic slices.
        r0 = pl.multiple_of(i * tm, tm)
        c0 = pl.multiple_of(k * tk, tk)
        emb = emb_ref[pl.ds(r0, tm), pl.ds(c0, tk)]
    else:
        emb = emb_ref[...]

    acc_ref[...] += jnp.dot(emb, ker, preferred_element_type=jnp.float32)

    # ---- epilogue: finalize inv-norm, rank-1 scale, clamp, scale, store ----
    @pl.when(k == nk - 1)
    def _():
        @pl.when(i == 0)
        def _():
            # Padded (all-zero) class columns get a large-but-finite inv-norm;
            # their logits are exactly 0 and are sliced off in the wrapper.
            kn_ref[...] = jax.lax.rsqrt(jnp.maximum(kn_ref[...], eps))

        cos = jnp.clip(acc_ref[...] * kn_ref[...], -1.0, 1.0) * s
        out_ref[...] = cos.astype(out_ref.dtype)


def prepare_mlloss_kernel(kernel, *, matmul_dtype=jnp.bfloat16, tn=512):
    """One-time preparation of the (D, C) class-weight parameter.

    Cast to the MXU dtype and pad the class axis to a tile multiple ONCE (at
    parameter creation / load time) instead of re-doing full HBM passes over
    the largest tensor on every forward call.
    """
    D, C = kernel.shape
    tn_eff = min(_round_up(tn, 128), _round_up(C, 128))
    Cp = _round_up(C, tn_eff)
    ker_mm = kernel.astype(matmul_dtype)
    if Cp != C:
        ker_mm = jnp.pad(ker_mm, ((0, 0), (0, Cp - C)))
    return {
        "ker_mm": ker_mm,
        "C": C,
        "tn": tn_eff,
        "matmul_dtype": jnp.dtype(matmul_dtype),
    }


def mlloss_forward(embeddings, kernel_or_prepared, label=None, *, s=64.0,
                   tm=256, tn=512, tk=1024,
                   matmul_dtype=jnp.bfloat16, out_dtype=jnp.float32,
                   eps=1e-12, emb_resident_budget=4 * 1024 * 1024):
    """Pallas implementation of MLLoss.forward.

    embeddings:         (N, D) float array.
    kernel_or_prepared: (D, C) weight array, or the dict from
                        `prepare_mlloss_kernel` (preferred: prep once, reuse).
    label:              accepted for signature parity; unused (as in torch).
    returns:            (N, C) scaled cosine logits in `out_dtype`
                        (bf16 is safe since values are clamped to [-s, s]).
    """
    del label  # unused by the torch forward as well

    if isinstance(kernel_or_prepared, dict):
        prep = kernel_or_prepared
    else:
        prep = prepare_mlloss_kernel(kernel_or_prepared,
                                     matmul_dtype=matmul_dtype, tn=tn)
    ker_mm = prep["ker_mm"]
    C = prep["C"]
    tn_eff = prep["tn"]
    matmul_dtype = prep["matmul_dtype"]
    D, Cp = ker_mm.shape

    N, D2 = embeddings.shape
    assert D == D2, "feature dims must match"

    # Row-normalize embeddings in f32 in the wrapper (tiny: N*D), THEN cast to
    # the MXU dtype; the kernel only applies the column (class) norms.
    emb32 = embeddings.astype(jnp.float32)
    inv_en = jax.lax.rsqrt(
        jnp.maximum(jnp.sum(emb32 * emb32, axis=1, keepdims=True), eps))
    emb_mm = (emb32 * inv_en).astype(matmul_dtype)

    # ---- tile sizes ---------------------------------------------------------
    itemsize = jnp.dtype(matmul_dtype).itemsize
    mult = _sublane_multiple(matmul_dtype)                 # 16 for bf16, 8 f32
    tm_eff = _round_up(min(tm, max(N, 1)), mult)
    Np = _round_up(N, tm_eff)
    if Np != N:
        emb_mm = jnp.pad(emb_mm, ((0, Np - N), (0, 0)))    # batch pad only

    # K (feature) tiling: largest multiple of 128 <= tk that divides D; keep
    # the full D slab when D is small or not 128-divisible.
    tk_eff = D
    if D % 128 == 0 and D > tk:
        t = (min(tk, D) // 128) * 128
        while t >= 128:
            if D % t == 0:
                tk_eff = t
                break
            t -= 128

    emb_resident = (Np * D * itemsize) <= emb_resident_budget

    grid = (Cp // tn_eff, Np // tm_eff, D // tk_eff)

    if emb_resident:
        # Constant index_map -> the whole (padded) embedding matrix is DMA'd
        # from HBM exactly once and stays resident; weights are also read from
        # HBM exactly once (inner axes only revisit them via VMEM).
        emb_spec = pl.BlockSpec((Np, D), lambda j, i, k: (0, 0))
    else:
        emb_spec = pl.BlockSpec((tm_eff, tk_eff), lambda j, i, k: (i, k))

    # VMEM estimate (double-buffered streams + scratch) -> raise the default
    # scoped-VMEM limit (16 MiB on v5e, 32 MiB on v6e/v7x) with headroom,
    # capped below v7x's 64 MiB physical VMEM.
    out_isz = jnp.dtype(out_dtype).itemsize
    vmem_est = ((2 * Np * D if emb_resident else 2 * tm_eff * tk_eff) * itemsize
                + 2 * tk_eff * tn_eff * itemsize
                + 2 * tm_eff * tn_eff * out_isz
                + tm_eff * tn_eff * 4
                + 8 * _round_up(tn_eff, 128) * 4)
    vmem_limit = int(min(64 * 1024 * 1024, max(32 * 1024 * 1024, 2 * vmem_est)))

    out = pl.pallas_call(
        functools.partial(_mlloss_kernel, s=float(s), eps=float(eps),
                          tm=tm_eff, tk=tk_eff, emb_resident=emb_resident),
        out_shape=jax.ShapeDtypeStruct((Np, Cp), out_dtype),
        grid_spec=pltpu.PrefetchScalarGridSpec(
            num_scalar_prefetch=0,
            grid=grid,
            in_specs=[
                emb_spec,                                             # embeddings
                pl.BlockSpec((tk_eff, tn_eff), lambda j, i, k: (k, j)),  # weights
            ],
            out_specs=pl.BlockSpec((tm_eff, tn_eff), lambda j, i, k: (i, j)),
            scratch_shapes=[
                pltpu.VMEM((tm_eff, tn_eff), jnp.float32),  # f32 K-accumulator
                pltpu.VMEM((1, tn_eff), jnp.float32),       # fused col inv-norms
            ],
        ),
        compiler_params=pltpu.CompilerParams(
            # Megacore split pinned to the class-tile axis (v7x); the inner
            # batch/K axes carry scratch state and must stay sequential.
            dimension_semantics=("parallel", "arbitrary", "arbitrary"),
            vmem_limit_bytes=vmem_limit,
        ),
    )(emb_mm, ker_mm)

    if Np != N or Cp != C:
        out = out[:N, :C]
    return out


def mlloss_reference(embeddings, kernel, s=64.0):
    """Pure-JAX f32 reference matching the torch module."""
    emb_n = embeddings / jnp.linalg.norm(embeddings, axis=1, keepdims=True)
    ker_n = kernel / jnp.linalg.norm(kernel, axis=0, keepdims=True)
    cos = jnp.clip(emb_n @ ker_n, -1.0, 1.0)
    return cos * s


def mlloss_reference_bf16(embeddings, kernel, s=64.0, eps=1e-12):
    """Matched-precision reference: f32-normalized rows cast to bf16, bf16
    weights, f32 accumulation, column norms from the bf16 weights."""
    emb32 = embeddings.astype(jnp.float32)
    inv_en = jax.lax.rsqrt(
        jnp.maximum(jnp.sum(emb32 * emb32, axis=1, keepdims=True), eps))
    emb_b = (emb32 * inv_en).astype(jnp.bfloat16)
    ker_b = kernel.astype(jnp.bfloat16)
    k32 = ker_b.astype(jnp.float32)
    inv_kn = jax.lax.rsqrt(
        jnp.maximum(jnp.sum(k32 * k32, axis=0, keepdims=True), eps))
    cos = jnp.dot(emb_b, ker_b, preferred_element_type=jnp.float32)
    return jnp.clip(cos * inv_kn, -1.0, 1.0) * s


if __name__ == "__main__":
    # Small, deterministic synthetic shapes: batch=16, embedding dim=128,
    # num classes=256.  The module's self.kernel is an (embedding_size,
    # classnum) parameter, initialized in-script.
    key = jax.random.PRNGKey(0)
    k_emb, k_ker = jax.random.split(key)

    N, D, C = 16, 128, 256
    s = 64.0

    embeddings = jax.random.normal(k_emb, (N, D), dtype=jnp.float32)
    kernel = jax.random.normal(k_ker, (D, C), dtype=jnp.float32) * 0.01

    # `label` is accepted by the PyTorch forward but never used.
    label = jnp.zeros((N,), dtype=jnp.int32)

    ref = mlloss_reference(embeddings, kernel, s=s)

    # Strict semantics check: f32 MXU path vs f32 reference.
    prep_f32 = prepare_mlloss_kernel(kernel, matmul_dtype=jnp.float32)
    out_f32 = jax.block_until_ready(
        mlloss_forward(embeddings, prep_f32, label, s=s))
    assert out_f32.shape == (N, C)
    assert jnp.allclose(out_f32, ref, atol=2e-3, rtol=2e-3), \
        "f32 path mismatch vs reference"

    # Default (performance) path: one-time bf16 weight prep, f32 accumulation.
    prep = prepare_mlloss_kernel(kernel)         # cast + class-pad ONCE
    out = jax.block_until_ready(mlloss_forward(embeddings, prep, label, s=s))
    assert out.shape == (N, C)
    assert float(jnp.max(jnp.abs(out - ref))) < 0.25, \
        "bf16 path deviates too much from f32 reference"
    ref_b = mlloss_reference_bf16(embeddings, kernel, s=s)
    assert float(jnp.max(jnp.abs(out - ref_b))) < 2e-2, \
        "bf16 path mismatch vs matched-precision reference"

    # bf16 output logits (values clamped to [-s, s], safe for downstream CE).
    out_b = jax.block_until_ready(
        mlloss_forward(embeddings, prep, label, s=s, out_dtype=jnp.bfloat16))
    assert out_b.shape == (N, C) and out_b.dtype == jnp.bfloat16
    assert float(jnp.max(jnp.abs(out_b.astype(jnp.float32) - ref))) < 0.5, \
        "bf16-output path deviates too much from f32 reference"

    print("KERNEL_OK")
</pallas_src>

<mosaic_0001>
module attributes {stable_mosaic.version = 11 : i64} {
  func.func @_mlloss_kernel(%arg0: i32, %arg1: i32, %arg2: i32, %arg3: memref<16x128xf32, #tpu.memory_space<vmem>>, %arg4: memref<128x256xf32, #tpu.memory_space<vmem>>, %arg5: memref<16x256xf32, #tpu.memory_space<vmem>>, %arg6: memref<16x256xf32, #tpu.memory_space<vmem>>, %arg7: memref<1x256xf32, #tpu.memory_space<vmem>>) attributes {dimension_semantics = [#tpu.dimension_semantics<parallel>, #tpu.dimension_semantics<arbitrary>, #tpu.dimension_semantics<arbitrary>], iteration_bounds = array<i64: 1, 1, 1>, scalar_prefetch = 0 : i64, scratch_operands = 2 : i64, tpu.core_type = #tpu.core_type<tc>, window_params = [{pipeline_mode = #tpu.pipeline_mode<synchronous>, transform_indices = @transform_0, window_bounds = array<i64: 16, 128>}, {transform_indices = @transform_1, window_bounds = array<i64: 128, 256>}, {transform_indices = @transform_2, window_bounds = array<i64: 16, 256>}]} {
    %c0 = arith.constant 0 : index
    %c0_0 = arith.constant 0 : index
    %0 = vector.load %arg4[%c0, %c0_0] : memref<128x256xf32, #tpu.memory_space<vmem>>, vector<128x256xf32>
    %c0_i32 = arith.constant 0 : i32
    %1 = arith.cmpi eq, %arg1, %c0_i32 : i32
    %2 = arith.extui %1 : i1 to i32
    %c0_i32_1 = arith.constant 0 : i32
    %3 = arith.cmpi ne, %2, %c0_i32_1 : i32
    scf.if %3 {
      %21 = arith.mulf %0, %0 : vector<128x256xf32>
      %cst_10 = arith.constant dense<0.000000e+00> : vector<256xf32>
      %22 = vector.multi_reduction <add>, %21, %cst_10 [0] : vector<128x256xf32> to vector<256xf32>
      %23 = vector.shape_cast %22 : vector<256xf32> to vector<1x256xf32>
      %c0_i32_11 = arith.constant 0 : i32
      %24 = arith.cmpi eq, %arg2, %c0_i32_11 : i32
      %25 = arith.extui %24 : i1 to i32
      %c0_i32_12 = arith.constant 0 : i32
      %26 = arith.cmpi ne, %25, %c0_i32_12 : i32
      scf.if %26 {
        %c0_15 = arith.constant 0 : index
        %c0_16 = arith.constant 0 : index
        %30 = vector.load %arg7[%c0_15, %c0_16] : memref<1x256xf32, #tpu.memory_space<vmem>>, vector<1x256xf32>
        tpu.vector_store %arg7[%c0_15, %c0_16], %23 {strides = array<i32>} : memref<1x256xf32, #tpu.memory_space<vmem>>, vector<1x256xf32>,
      } else {
      }
      %c0_i32_13 = arith.constant 0 : i32
      %27 = arith.cmpi ne, %arg2, %c0_i32_13 : i32
      %28 = arith.extui %27 : i1 to i32
      %c0_i32_14 = arith.constant 0 : i32
      %29 = arith.cmpi ne, %28, %c0_i32_14 : i32
      scf.if %29 {
        %c0_15 = arith.constant 0 : index
        %c0_16 = arith.constant 0 : index
        %30 = vector.load %arg7[%c0_15, %c0_16] : memref<1x256xf32, #tpu.memory_space<vmem>>, vector<1x256xf32>
        %31 = arith.addf %30, %23 : vector<1x256xf32>
        %c0_17 = arith.constant 0 : index
        %c0_18 = arith.constant 0 : index
        %32 = vector.load %arg7[%c0_17, %c0_18] : memref<1x256xf32, #tpu.memory_space<vmem>>, vector<1x256xf32>
        tpu.vector_store %arg7[%c0_17, %c0_18], %31 {strides = array<i32>} : memref<1x256xf32, #tpu.memory_space<vmem>>, vector<1x256xf32>,
      } else {
      }
    } else {
    }
    %c0_i32_2 = arith.constant 0 : i32
    %4 = arith.cmpi eq, %arg2, %c0_i32_2 : i32
    %5 = arith.extui %4 : i1 to i32
    %c0_i32_3 = arith.constant 0 : i32
    %6 = arith.cmpi ne, %5, %c0_i32_3 : i32
    scf.if %6 {
      %cst_10 = arith.constant 0.000000e+00 : f32
      %21 = vector.broadcast %cst_10 : f32 to vector<16x256xf32>
      %c0_11 = arith.constant 0 : index
      %c0_12 = arith.constant 0 : index
      %22 = vector.load %arg6[%c0_11, %c0_12] : memref<16x256xf32, #tpu.memory_space<vmem>>, vector<16x256xf32>
      tpu.vector_store %arg6[%c0_11, %c0_12], %21 {strides = array<i32>} : memref<16x256xf32, #tpu.memory_space<vmem>>, vector<16x256xf32>,
    } else {
    }
    %c16_i32 = arith.constant 16 : i32
    %7 = arith.muli %arg1, %c16_i32 : i32
    %8 = tpu.assume_multiple %7, 16 : i32
    %c128_i32 = arith.constant 128 : i32
    %9 = arith.muli %arg2, %c128_i32 : i32
    %10 = tpu.assume_multiple %9, 128 : i32
    %11 = arith.index_cast %8 : i32 to index
    %12 = arith.index_cast %10 : i32 to index
    %13 = vector.load %arg3[%11, %12] : memref<16x128xf32, #tpu.memory_space<vmem>>, vector<16x128xf32>
    %c0_4 = arith.constant 0 : index
    %c0_5 = arith.constant 0 : index
    %14 = vector.load %arg6[%c0_4, %c0_5] : memref<16x256xf32, #tpu.memory_space<vmem>>, vector<16x256xf32>
    %cst = arith.constant dense<0.000000e+00> : vector<16x256xf32>
    %15 = tpu.matmul %13, %0, %cst {dimension_numbers = #tpu.dot_dimension_numbers<[1], [0], [0], [1], [0, 0, 1, 1], [], []>} : vector<16x128xf32>, vector<128x256xf32>, vector<16x256xf32> -> vector<16x256xf32>
    %16 = arith.addf %14, %15 : vector<16x256xf32>
    %c0_6 = arith.constant 0 : index
    %c0_7 = arith.constant 0 : index
    %17 = vector.load %arg6[%c0_6, %c0_7] : memref<16x256xf32, #tpu.memory_space<vmem>>, vector<16x256xf32>
    tpu.vector_store %arg6[%c0_6, %c0_7], %16 {strides = array<i32>} : memref<16x256xf32, #tpu.memory_space<vmem>>, vector<16x256xf32>,
    %c0_i32_8 = arith.constant 0 : i32
    %18 = arith.cmpi eq, %arg2, %c0_i32_8 : i32
    %19 = arith.extui %18 : i1 to i32
    %c0_i32_9 = arith.constant 0 : i32
    %20 = arith.cmpi ne, %19, %c0_i32_9 : i32
    scf.if %20 {
      %c0_i32_10 = arith.constant 0 : i32
      %21 = arith.cmpi eq, %arg1, %c0_i32_10 : i32
      %22 = arith.extui %21 : i1 to i32
      %c0_i32_11 = arith.constant 0 : i32
      %23 = arith.cmpi ne, %22, %c0_i32_11 : i32
      scf.if %23 {
        %c0_21 = arith.constant 0 : index
        %c0_22 = arith.constant 0 : index
        %35 = vector.load %arg7[%c0_21, %c0_22] : memref<1x256xf32, #tpu.memory_space<vmem>>, vector<1x256xf32>
        %cst_23 = arith.constant 9.99999996E-13 : f32
        %36 = vector.broadcast %cst_23 : f32 to vector<1x256xf32>
        %37 = arith.maximumf %35, %36 : vector<1x256xf32>
        %38 = math.rsqrt %37 : vector<1x256xf32>
        %c0_24 = arith.constant 0 : index
        %c0_25 = arith.constant 0 : index
        %39 = vector.load %arg7[%c0_24, %c0_25] : memref<1x256xf32, #tpu.memory_space<vmem>>, vector<1x256xf32>
        tpu.vector_store %arg7[%c0_24, %c0_25], %38 {strides = array<i32>} : memref<1x256xf32, #tpu.memory_space<vmem>>, vector<1x256xf32>,
      } else {
      }
      %c0_12 = arith.constant 0 : index
      %c0_13 = arith.constant 0 : index
      %24 = vector.load %arg6[%c0_12, %c0_13] : memref<16x256xf32, #tpu.memory_space<vmem>>, vector<16x256xf32>
      %c0_14 = arith.constant 0 : index
      %c0_15 = arith.constant 0 : index
      %25 = vector.load %arg7[%c0_14, %c0_15] : memref<1x256xf32, #tpu.memory_space<vmem>>, vector<1x256xf32>
      %26 = vector.broadcast %25 : vector<1x256xf32> to vector<16x256xf32>
      %27 = arith.mulf %24, %26 : vector<16x256xf32>
      %cst_16 = arith.constant -1.000000e+00 : f32
      %cst_17 = arith.constant 1.000000e+00 : f32
      %28 = vector.broadcast %cst_16 : f32 to vector<16x256xf32>
      %29 = arith.maximumf %28, %27 : vector<16x256xf32>
      %30 = vector.broadcast %cst_17 : f32 to vector<16x256xf32>
      %31 = arith.minimumf %30, %29 : vector<16x256xf32>
      %cst_18 = arith.constant 6.400000e+01 : f32
      %32 = vector.broadcast %cst_18 : f32 to vector<16x256xf32>
      %33 = arith.mulf %31, %32 : vector<16x256xf32>
      %c0_19 = arith.constant 0 : index
      %c0_20 = arith.constant 0 : index
      %34 = vector.load %arg5[%c0_19, %c0_20] : memref<16x256xf32, #tpu.memory_space<vmem>>, vector<16x256xf32>
      tpu.vector_store %arg5[%c0_19, %c0_20], %33 {strides = array<i32>} : memref<16x256xf32, #tpu.memory_space<vmem>>, vector<16x256xf32>,
    } else {
    }
    return
  }
  func.func @transform_0(%arg0: i32, %arg1: i32, %arg2: i32) -> (i32, i32) {
    %c0_i32 = arith.constant 0 : i32
    %c0_i32_0 = arith.constant 0 : i32
    %c0_i32_1 = arith.constant 0 : i32
    return %c0_i32, %c0_i32_0 : i32, i32
  }
  func.func @transform_1(%arg0: i32, %arg1: i32, %arg2: i32) -> (i32, i32) {
    %c0_i32 = arith.constant 0 : i32
    return %arg2, %arg0 : i32, i32
  }
  func.func @transform_2(%arg0: i32, %arg1: i32, %arg2: i32) -> (i32, i32) {
    %c0_i32 = arith.constant 0 : i32
    return %arg1, %arg0 : i32, i32
  }
}

</mosaic_0001>

<bundles_post_ra>
// kernel: tpu_custom_call.1
= control target key start
LH: loop header
LB: loop body
LE: loop exit
PB: predicated region body
PF: predicated region fallthrough
CT: control target
= control target key end

     0   :  { %7 = vsyncpa [#allocation5], 0  ;;  %s622_s0 = inlined_call_operand.hbm [shape: f32[16,128], index: 0, kind: input, shape index: {}]   ;;  %s623_s1 = inlined_call_operand.hbm [shape: f32[128,256], index: 1, kind: input, shape index: {}]   ;;  %s624_s2 = inlined_call_operand.hbm [shape: f32[16,256], index: 2, kind: output, shape index: {}]  }
   0x1   :  { %8 = vsyncpa [#allocation8], 0 }
   0x2   :  { %9 = vsyncpa [#allocation6], 0  ;;  %s14_s11 = sshll.u32 %s622_s0, 4  ;;  %s457_s12 = smov [#allocation4]   ;;  %s15_s11 = int_to_ptr.hbm [resolvable:$true] %s14_s11 }
   0x3   :  { %s16_s13 = sshll.u32 %s457_s12, 4  ;;  %s27_s16 = sshll.u32 %s623_s1, 4  ;;  %s17_s13 = int_to_ptr.vmem [resolvable:$true] %s16_s13  ;;  %s28_s16 = int_to_ptr.hbm [resolvable:$true] %s27_s16 }
   0x4   :  { %s458_s17 = smov 128   ;;  %s459_s18 = smov 8  }
   0x5   :  { %22 = dma.hbm_to_vmem [thread:$0]  %s15_s11, 256, %s17_s13, [#allocation5], %s458_s17, %s458_s17, %s459_s18  }
   0x6   :  { %s460_s19 = smov [#allocation7]   ;;  %s461_s21 = smov 256  }
   0x7   :  { %s29_s20 = sshll.u32 %s460_s19, 4  ;;  %s462_s22 = smov 16   ;;  %s30_s20 = int_to_ptr.vmem [resolvable:$true] %s29_s20 }
   0x8   :  { %35 = dma.hbm_to_vmem [thread:$0]  %s28_s16, 4096, %s30_s20, [#allocation8], %s461_s21, %s461_s21, %s462_s22  }
   0x9   :  { %451 = dma.done.wait [#allocation5], 256  }
   0xa   :  { %452 = vsyncadd [#allocation5], 4294967040 }
   0xb   :  { %453 = dma.done.wait [#allocation8], 4096  }
   0xc   :  { %454 = vsyncadd [#allocation8], 4294963200  ;;  %v488_v0 = vld [vmem:[#allocation7 + $0xf0] sm:$0xff]  ;;  %v490_v1 = vld [vmem:[#allocation7 + $0xf8] sm:$0xff]  ;;  %vm161_vm0 = vcmask 1040384   ;;  %s463_s0 = smov [#allocation9]  }
   0xd   :  { %v492_v2 = vld [vmem:[#allocation7 + $0xe0] sm:$0xff]  ;;  %338 = vmatpush.msra.mxu2 %v488_v0  ;;  %354 = vmatpush.msra.mxu3 %v490_v1  ;;  %v496_v3 = vld [vmem:[#allocation7 + $0xe8] sm:$0xff]  ;;  %v498_v4 = vld [vmem:[#allocation7 + $0xd0] sm:$0xff]  ;;  %s317_s1 = sshll.u32 %s463_s0, 4  ;;  %s319_s25 = sshll.u32 %s624_s2, 4  ;;  %s318_s1 = int_to_ptr.vmem [resolvable:$true] %s317_s1  ;;  %s320_s25 = int_to_ptr.hbm [resolvable:$true] %s319_s25 }
   0xe   :  { %v500_v5 = vld [vmem:[#allocation7 + $0xd8] sm:$0xff]  ;;  %206 = vmatpush.msra.mxu0 %v488_v0  ;;  %229 = vmatpush.msra.mxu1 %v490_v1  ;;  %v506_v6 = vld [vmem:[#allocation7 + $0xc0] sm:$0xff]  ;;  %v508_v7 = vld [vmem:[#allocation7 + $0xc8] sm:$0xff] }
   0xf   :  { %339 = vmatpush.msra.mxu2 %v492_v2  ;;  %355 = vmatpush.msra.mxu3 %v496_v3  ;;  %v514_v8 = vld [vmem:[#allocation7 + $0xb0] sm:$0xff]  ;;  %v516_v9 = vld [vmem:[#allocation7 + $0xb8] sm:$0xff]  ;;  %v520_v10 = vld [vmem:[#allocation7] sm:$0xff] }
  0x10   :  { %207 = vmatpush.msra.mxu0 %v492_v2  ;;  %230 = vmatpush.msra.mxu1 %v496_v3  ;;  %v524_v11 = vld [vmem:[#allocation7 + $0x10] sm:$0xff]  ;;  %v526_v12 = vld [vmem:[#allocation7 + $0x20] sm:$0xff]  ;;  %v80_v13 = vmul.f32 %v520_v10, %v520_v10  ;;  %v532_v15 = vld [vmem:[#allocation7 + $0xa8] sm:$0xff]  ;;  %v102_v60 = vmul.f32 %v514_v8, %v514_v8 }
  0x11   :  { %340 = vmatpush.msra.mxu2 %v498_v4  ;;  %356 = vmatpush.msra.mxu3 %v500_v5  ;;  %v530_v14 = vld [vmem:[#allocation7 + $0xa0] sm:$0xff]  ;;  %v82_v16 = vmul.f32 %v524_v11, %v524_v11  ;;  %v84_v17 = vmul.f32 %v526_v12, %v526_v12  ;;  %v542_v18 = vld [vmem:[#allocation7 + $0x30] sm:$0xff]  ;;  %v544_v20 = vld [vmem:[#allocation7 + $0x98] sm:$0xff] }
  0x12   :  { %208 = vmatpush.msra.mxu0 %v498_v4  ;;  %231 = vmatpush.msra.mxu1 %v500_v5  ;;  %v62_v19 = vld [vmem:[#allocation7 + $0x90] sm:$0xff]  ;;  %v86_v21 = vmul.f32 %v542_v18, %v542_v18  ;;  %v52_v23 = vld [vmem:[#allocation7 + $0x40] sm:$0xff]  ;;  %v552_v25 = vld [vmem:[#allocation7 + $0x88] sm:$0xff]  ;;  %v100_v56 = vmul.f32 %v530_v14, %v530_v14 }
  0x13   :  { %341 = vmatpush.msra.mxu2 %v506_v6  ;;  %357 = vmatpush.msra.mxu3 %v508_v7  ;;  %v112_v22 = vadd.f32 %v82_v16, %v80_v13  ;;  %v60_v24 = vld [vmem:[#allocation7 + $0x80] sm:$0xff]  ;;  %v88_v26 = vmul.f32 %v52_v23, %v52_v23  ;;  %v54_v28 = vld [vmem:[#allocation7 + $0x50] sm:$0xff]  ;;  %v59_v30 = vld [vmem:[#allocation7 + $0x78] sm:$0xff]  ;;  %v98_v52 = vmul.f32 %v62_v19, %v62_v19 }
  0x14   :  { %209 = vmatpush.msra.mxu0 %v506_v6  ;;  %232 = vmatpush.msra.mxu1 %v508_v7  ;;  %v58_v29 = vld [vmem:[#allocation7 + $0x70] sm:$0xff]  ;;  %v90_v31 = vmul.f32 %v54_v28, %v54_v28  ;;  %v56_v33 = vld [vmem:[#allocation7 + $0x60] sm:$0xff]  ;;  %v57_v35 = vld [vmem:[#allocation7 + $0x68] sm:$0xff]  ;;  %v96_v46 = vmul.f32 %v60_v24, %v60_v24  ;;  %v104_v13 = vmul.f32 %v506_v6, %v506_v6 }
  0x15   :  { %342 = vmatpush.msra.mxu2 %v514_v8  ;;  %358 = vmatpush.msra.mxu3 %v516_v9  ;;  %v113_v27 = vadd.f32 %v112_v22, %v84_v17  ;;  %v92_v34 = vmul.f32 %v56_v33, %v56_v33  ;;  %v94_v37 = vmul.f32 %v58_v29, %v58_v29  ;;  %v560_v38 = vld [vmem:[#allocation7 + $0x8] sm:$0xff]  ;;  %v562_v39 = vld [vmem:[#allocation7 + $0x18] sm:$0xff] }
  0x16   :  { %210 = vmatpush.msra.mxu0 %v514_v8  ;;  %233 = vmatpush.msra.mxu1 %v516_v9  ;;  %v49_v40 = vld [vmem:[#allocation7 + $0x28] sm:$0xff]  ;;  %v55_v42 = vld [vmem:[#allocation7 + $0x58] sm:$0xff]  ;;  %v81_v43 = vmul.f32 %v560_v38, %v560_v38  ;;  %v83_v44 = vmul.f32 %v562_v39, %v562_v39  ;;  %v93_v61 = vmul.f32 %v57_v35, %v57_v35 }
  0x17   :  { %343 = vmatpush.msra.mxu2 %v530_v14  ;;  %359 = vmatpush.msra.mxu3 %v532_v15  ;;  %v114_v32 = vadd.f32 %v113_v27, %v86_v21  ;;  %v85_v45 = vmul.f32 %v49_v40, %v49_v40  ;;  %v51_v47 = vld [vmem:[#allocation7 + $0x38] sm:$0xff]  ;;  %v53_v49 = vld [vmem:[#allocation7 + $0x48] sm:$0xff]  ;;  %v91_v58 = vmul.f32 %v55_v42, %v55_v42 }
  0x18   :  { %211 = vmatpush.msra.mxu0 %v530_v14  ;;  %234 = vmatpush.msra.mxu1 %v532_v15  ;;  %v87_v50 = vmul.f32 %v51_v47, %v51_v47  ;;  %v133_v51 = vadd.f32 %v83_v44, %v81_v43  ;;  %v89_v54 = vmul.f32 %v53_v49, %v53_v49  ;;  %v164_v44 = vlaneseq }
  0x19   :  { %344 = vmatpush.msra.mxu2 %v62_v19  ;;  %360 = vmatpush.msra.mxu3 %v544_v20  ;;  %v115_v36 = vadd.f32 %v114_v32, %v88_v26  ;;  %v95_v14 = vmul.f32 %v59_v30, %v59_v30  ;;  %v106_v8 = vmul.f32 %v498_v4, %v498_v4  ;;  %v200_v4 = vld [vmem:[#allocation4] sm:$0xff] }
  0x1a   :  { %212 = vmatpush.msra.mxu0 %v62_v19  ;;  %235 = vmatpush.msra.mxu1 %v544_v20  ;;  %v134_v55 = vadd.f32 %v133_v51, %v85_v45  ;;  %v97_v6 = vmul.f32 %v552_v25, %v552_v25  ;;  %v108_v22 = vmul.f32 %v492_v2, %v492_v2  ;;  %vm608_vm1 = vcmp.lt.s32.totalorder %v164_v44, 256 }
  0x1b   :  { %345 = vmatpush.msra.mxu2 %v60_v24  ;;  %361 = vmatpush.msra.mxu3 %v552_v25  ;;  %v116_v41 = vadd.f32 %v115_v36, %v90_v31  ;;  %v101_v2 = vmul.f32 %v532_v15, %v532_v15  ;;  %v109_v32 = vmul.f32 %v496_v3, %v496_v3 }
  0x1c   :  { %213 = vmatpush.msra.mxu0 %v60_v24  ;;  %236 = vmatpush.msra.mxu1 %v552_v25  ;;  %v135_v59 = vadd.f32 %v134_v55, %v87_v50 }
  0x1d   :  { %346 = vmatpush.msra.mxu2 %v58_v29  ;;  %362 = vmatpush.msra.mxu3 %v59_v30  ;;  %v117_v48 = vadd.f32 %v116_v41, %v92_v34 }
  0x1e   :  { %214 = vmatpush.msra.mxu0 %v58_v29  ;;  %237 = vmatpush.msra.mxu1 %v59_v30  ;;  %v136_v63 = vadd.f32 %v135_v59, %v89_v54 }
  0x1f   :  { %347 = vmatpush.msra.mxu2 %v56_v33  ;;  %363 = vmatpush.msra.mxu3 %v57_v35  ;;  %v118_v53 = vadd.f32 %v117_v48, %v94_v37 }
  0x20   :  { %215 = vmatpush.msra.mxu0 %v56_v33  ;;  %238 = vmatpush.msra.mxu1 %v57_v35  ;;  %v137_v17 = vadd.f32 %v136_v63, %v91_v58 }
  0x21   :  { %348 = vmatpush.msra.mxu2 %v54_v28  ;;  %364 = vmatpush.msra.mxu3 %v55_v42  ;;  %v119_v57 = vadd.f32 %v118_v53, %v96_v46 }
  0x22   :  { %216 = vmatpush.msra.mxu0 %v54_v28  ;;  %239 = vmatpush.msra.mxu1 %v55_v42  ;;  %v138_v21 = vadd.f32 %v137_v17, %v93_v61 }
  0x23   :  { %349 = vmatpush.msra.mxu2 %v52_v23  ;;  %365 = vmatpush.msra.mxu3 %v53_v49  ;;  %v120_v62 = vadd.f32 %v119_v57, %v98_v52 }
  0x24   :  { %217 = vmatpush.msra.mxu0 %v52_v23  ;;  %240 = vmatpush.msra.mxu1 %v53_v49  ;;  %v139_v24 = vadd.f32 %v138_v21, %v95_v14 }
  0x25   :  { %350 = vmatpush.msra.mxu2 %v542_v18  ;;  %366 = vmatpush.msra.mxu3 %v51_v47  ;;  %v121_v16 = vadd.f32 %v120_v62, %v100_v56 }
  0x26   :  { %218 = vmatpush.msra.mxu0 %v542_v18  ;;  %241 = vmatpush.msra.mxu1 %v51_v47  ;;  %v201_v18 = vld [vmem:[#allocation4 + $0x8] sm:$0xff]  ;;  %v140_v26 = vadd.f32 %v139_v24, %v97_v6 }
  0x27   :  { %351 = vmatpush.msra.mxu2 %v526_v12  ;;  %367 = vmatpush.msra.mxu3 %v49_v40  ;;  %v122_v19 = vadd.f32 %v121_v16, %v102_v60 }
  0x28   :  { %219 = vmatpush.msra.mxu0 %v526_v12  ;;  %242 = vmatpush.msra.mxu1 %v49_v40  ;;  %v99_v12 = vmul.f32 %v544_v20, %v544_v20  ;;  %v103_v20 = vmul.f32 %v516_v9, %v516_v9  ;;  %v111_v9 = vmul.f32 %v490_v1, %v490_v1 }
  0x29   :  { %352 = vmatpush.msra.mxu2 %v524_v11  ;;  %368 = vmatpush.msra.mxu3 %v562_v39  ;;  %v123_v23 = vadd.f32 %v122_v19, %v104_v13 }
  0x2a   :  { %220 = vmatpush.msra.mxu0 %v524_v11  ;;  %243 = vmatpush.msra.mxu1 %v562_v39  ;;  %v110_v11 = vmul.f32 %v488_v0, %v488_v0  ;;  %v141_v28 = vadd.f32 %v140_v26, %v99_v12  ;;  %v107_v0 = vmul.f32 %v500_v5, %v500_v5 }
  0x2b   :  { %353 = vmatpush.msra.mxu2 %v520_v10  ;;  %369 = vmatpush.msra.mxu3 %v560_v38  ;;  %v124_v25 = vadd.f32 %v123_v23, %v106_v8 }
  0x2c   :  { %225 = vmatmul.f32.vlgmr.msra.gmra.mxu2 %v201_v18  ;;  %248 = vmatmul.f32.vlgmr.msra.gmra.mxu3 %v201_v18  ;;  %v142_v30 = vadd.f32 %v141_v28, %v101_v2 }
  0x2d   :  { %221 = vmatpush.msra.mxu0 %v520_v10  ;;  %244 = vmatpush.msra.mxu1 %v560_v38  ;;  %v125_v27 = vadd.f32 %v124_v25, %v108_v22  ;;  %v105_v10 = vmul.f32 %v508_v7, %v508_v7 }
  0x2e   :  { %222 = vmatmul.f32.vlgmr.msra.gmra.mxu0 %v200_v4  ;;  %245 = vmatmul.f32.vlgmr.msra.gmra.mxu1 %v200_v4  ;;  %v143_v31 = vadd.f32 %v142_v30, %v103_v20 }
  0x2f   :  { %v126_v29 = vadd.f32 %v125_v27, %v110_v11 }
  0x30   :  { %v144_v33 = vadd.f32 %v143_v31, %v105_v10 }
  0x31   :  { %v127_v15 = vrot.slane %v126_v29, 4 }
  0x32   :  { %v145_v35 = vadd.f32 %v144_v33, %v107_v0 }
  0x33   :  { %v128_v34 = vadd.f32 %v127_v15, %v126_v29 }
  0x34   :  { %v146_v36 = vadd.f32 %v145_v35, %v109_v32 }
  0x35   :  { %v129_v37 = vrot.slane %v128_v34, 2 }
  0x36   :  { %v147_v38 = vadd.f32 %v146_v36, %v111_v9 }
  0x37   :  { %v130_v39 = vadd.f32 %v129_v37, %v128_v34 }
  0x38   :  { %v148_v7 = vrot.slane %v147_v38, 4 }
  0x39   :  { %v131_v42 = vrot.slane %v130_v39, 1 }
  0x3a   :  { %v149_v40 = vadd.f32 %v148_v7, %v147_v38 }
  0x3b   :  { %v132_v45 = vadd.f32 %v131_v42, %v130_v39 }
  0x3c   :  { %v150_v41 = vrot.slane %v149_v40, 2 }
  0x3e   :  { %v151_v5 = vadd.f32 %v150_v41, %v149_v40 }
  0x40   :  { %v152_v43 = vrot.slane %v151_v5, 1 }
  0x42   :  { %v153_v46 = vadd.f32 %v152_v43, %v151_v5 }
  0x44   :  { %v160_v3 = vrot.slane %v153_v46, 7 }
  0x46   :  { %v162_v1 = vsel %vm161_vm0, %v132_v45, %v160_v3 }
  0x47   :  { %168 = vst.msk [vmem:[#allocation3] sm:$0x3] %vm608_vm1, %v162_v1 }
  0x4e   :  { %v266_v48 = vld [vmem:[#allocation3] sm:$0x3] }
  0x4f   :  { %v267_v49 = vmax.f32 %v266_v48, 1e-12 }
  0x51   :  { %377 = vrsqrt.f32 %v267_v49  ;;  %vm274_vm2 = vweird.f32 %v267_v49 }
  0x57   :  { %v378_v50 = vpop.eup %377 }
  0x58   :  { %v269_v51 = vmul.f32 %v378_v50, %v267_v49  ;;  %vm275_vm3 = vweird.f32 %v378_v50 }
  0x59   :  { %vm276_vm4 = vmor %vm274_vm2, %vm275_vm3 }
  0x5a   :  { %v270_v52 = vmul.f32 %v378_v50, %v269_v51 }
  0x5c   :  { %v271_v53 = vmul.f32 0.5, %v270_v52 }
  0x5e   :  { %v272_v54 = vsub.f32 1.5, %v271_v53 }
  0x60   :  { %v273_v55 = vmul.f32 %v378_v50, %v272_v54 }
  0x62   :  { %v277_v56 = vsel %vm276_vm4, %v378_v50, %v273_v55 }
  0x63   :  { %282 = vst.msk [vmem:[#allocation3] sm:$0x3] %vm608_vm1, %v277_v56 }
  0x6a   :  { %v287_v57 = vld [vmem:[#allocation3] sm:$0x3] }
  0x6b   :  { %v289_v58 = vperm.slane %v287_v57, 0  ;;  %v290_v59 = vperm.slane %v287_v57, 1 }
  0xab   :  { %v223_v60 = vpop.f32.mrf.mxu0  ;;  %v246_v62 = vpop.f32.mrf.mxu1 }
  0xac   :  { %v293_v61 = vmul.f32 %v289_v58, %v223_v60  ;;  %v294_v13 = vmul.f32 %v290_v59, %v246_v62 }
  0xae   :  { %v334_v63 = vclamps-f32 %v293_v61, 1.0  ;;  %v335_v18 = vclamps-f32 %v294_v13, 1.0 }
  0xaf   :  { %v226_v14 = vpop.f32.mrf.mxu2  ;;  %v249_v16 = vpop.f32.mrf.mxu3 }
  0xb0   :  { %v305_v17 = vmul.f32 64.0, %v334_v63  ;;  %v295_v8 = vmul.f32 %v289_v58, %v226_v14  ;;  %v296_v6 = vmul.f32 %v290_v59, %v249_v16  ;;  %v306_v21 = vmul.f32 64.0, %v335_v18 }
  0xb2   :  { %309 = vst [vmem:[#allocation9] sm:$0xff] %v305_v17  ;;  %v336_v19 = vclamps-f32 %v295_v8, 1.0  ;;  %v337_v22 = vclamps-f32 %v296_v6, 1.0 }
  0xb3   :  { %310 = vst [vmem:[#allocation9 + $0x8] sm:$0xff] %v306_v21 }
  0xb4   :  { %v307_v4 = vmul.f32 64.0, %v336_v19  ;;  %v308_v12 = vmul.f32 64.0, %v337_v22 }
  0xb6   :  { %311 = vst [vmem:[#allocation9 + $0x10] sm:$0xff] %v307_v4 }
  0xb7   :  { %312 = vst [vmem:[#allocation9 + $0x18] sm:$0xff] %v308_v12 }
  0xb8   :  { %325 = dma.vmem_to_hbm [thread:$0]  %s318_s1, 512, %s320_s25, [#allocation6], %s461_s21, %s461_s21, %s462_s22  }
  0xb9   :  { %455 = dma.done.wait [#allocation6], 512  }
  0xba   :  { %456 = vsyncadd [#allocation6], 4294966784 }
  0xbb   :  { %330 = vsyncpa [#allocation5], 1 }
  0xbc   :  { %331 = vsyncpa [#allocation8], 1 }
  0xbd   :  { %332 = vsyncpa [#allocation6], 1 }

</bundles_post_ra>
